<compile_context>
chip_gen: v6e
topology: v6e:2x2x1
jax: 0.10.0
libtpu: 0.0.40
codegen_flags: <defaults>
</compile_context>

<pallas_src>
import functools
from dataclasses import dataclass

import jax
import jax.numpy as jnp
from jax.experimental import pallas as pl
from jax.experimental.pallas import tpu as pltpu


@dataclass(frozen=True)
class YOLOConfig:
    S: int = 4   # grid size (small demo; canonical YOLOv1 is 7)
    B: int = 2   # boxes per cell (loss hard-codes 2)
    C: int = 4   # number of classes (canonical is 20)

    @property
    def CELL_NODES(self) -> int:
        return self.C + 5 * self.B


LAMBDA_COORD = 5.0
LAMBDA_NOOBJ = 0.5

_LANES = 128
_SUBLANES = 8
# Double-buffered input tiles + resident output block must fit this budget.
# 28 MiB keeps the pipeline under v7x's 64 MiB physical VMEM (with a 40 MiB
# scoped limit) and is trivially fine on v5e/v6e (128 MiB physical).
_VMEM_INPUT_BUDGET = 28 << 20
_VMEM_LIMIT_BYTES = 40 << 20


def _yolo_loss_kernel(pred_ref, label_ref, out_ref, *, C):
    """pred_ref: (CELL_NODES, tile_r, 128), label_ref: (C+5, tile_r, 128)
    field-major tiles.  out_ref: (tile_r, 128) per-lane partial-sum
    accumulator, resident across the reduction axis (same output block for
    every step of grid axis 1); reduced to a scalar in the wrapper."""
    t = pl.program_id(1)

    @pl.when(t == 0)
    def _init():
        out_ref[...] = jnp.zeros_like(out_ref)

    # Dense (tile_r, 128) tiles, one per field.
    p1_pc = pred_ref[C]
    p1x, p1y = pred_ref[C + 1], pred_ref[C + 2]
    p1w, p1h = pred_ref[C + 3], pred_ref[C + 4]
    p2_pc = pred_ref[C + 5]
    p2x, p2y = pred_ref[C + 6], pred_ref[C + 7]
    p2w, p2h = pred_ref[C + 8], pred_ref[C + 9]
    l_pc = label_ref[C]
    lx, ly = label_ref[C + 1], label_ref[C + 2]
    lw, lh = label_ref[C + 3], label_ref[C + 4]

    # Label-box corners / area computed once (hoisted out of both IoUs).
    lx1 = lx - lw * 0.5
    ly1 = ly - lh * 0.5
    lx2 = lx + lw * 0.5
    ly2 = ly + lh * 0.5
    area_l = jnp.abs((lx2 - lx1) * (ly2 - ly1))

    def inter_union(px, py, pw, ph):
        px1 = px - pw * 0.5
        py1 = py - ph * 0.5
        px2 = px + pw * 0.5
        py2 = py + ph * 0.5
        ix1 = jnp.maximum(px1, lx1)
        iy1 = jnp.maximum(py1, ly1)
        ix2 = jnp.minimum(px2, lx2)
        iy2 = jnp.minimum(py2, ly2)
        inter = jnp.maximum(ix2 - ix1, 0.0) * jnp.maximum(iy2 - iy1, 0.0)
        area_p = jnp.abs((px2 - px1) * (py2 - py1))
        union = area_p + area_l - inter + 1e-6
        return inter, union

    inter1, u1 = inter_union(p1x, p1y, p1w, p1h)
    inter2, u2 = inter_union(p2x, p2y, p2w, p2h)

    # Best-box selection without dividing: iou1 >= iou2 <=> inter1*u2 >=
    # inter2*u1 (both unions strictly positive).  Box 1 wins ties, matching
    # torch.argmax over [iou1, iou2].
    best1 = inter1 * u2 >= inter2 * u1

    bx = jnp.where(best1, p1x, p2x)
    by = jnp.where(best1, p1y, p2y)
    bw = jnp.where(best1, p1w, p2w)
    bh = jnp.where(best1, p1h, p2h)
    b_pc = jnp.where(best1, p1_pc, p2_pc)
    # Single exact divide for the selected IoU (the dconf target).  Kept exact
    # (approx reciprocal would perturb the reference tolerance).
    b_iou = jnp.where(best1, inter1, inter2) / jnp.where(best1, u1, u2)

    obj = l_pc
    noobj = 1.0 - obj

    # Factored masked differences: obj * (a - b) (exact for binary obj).
    dx = obj * (bx - lx)
    dy = obj * (by - ly)
    dw = obj * (jnp.sqrt(jnp.maximum(bw, 1e-6)) - jnp.sqrt(lw))
    dh = obj * (jnp.sqrt(jnp.maximum(bh, 1e-6)) - jnp.sqrt(lh))
    dconf = obj * (b_pc - b_iou)
    n1 = noobj * p1_pc
    n2 = noobj * p2_pc

    cls_err = jnp.zeros_like(obj)
    for c in range(C):
        dc = obj * (pred_ref[c] - label_ref[c])
        cls_err = cls_err + dc * dc

    # Single fused weighted squared-error tile; no in-kernel cross-lane reduce.
    err = (LAMBDA_COORD * (dx * dx + dy * dy + dw * dw + dh * dh)
           + dconf * dconf
           + LAMBDA_NOOBJ * (n1 * n1 + n2 * n2)
           + cls_err)

    out_ref[...] += err


def yolo_loss(pred, label, cfg: YOLOConfig):
    """pred, label: (batch, S, S, CELL_NODES) -> scalar loss."""
    b_s = pred.shape[0]
    C, D = cfg.C, cfg.CELL_NODES
    D_LAB = C + 5                      # only classes + obj + box1 are ever read
    N = b_s * cfg.S * cfg.S

    # ---- tile-size selection from the VMEM budget --------------------------
    # Double-buffered working set per row of a tile:
    #   2 buffers x (D + D_LAB) fields x 128 lanes x 4B  + output (x2) row.
    bytes_per_row = (2 * (D + D_LAB) + 2) * _LANES * 4
    rows = pl.cdiv(N, _LANES)
    rows = max(_SUBLANES, ((rows + _SUBLANES - 1) // _SUBLANES) * _SUBLANES)
    tile_r = _SUBLANES
    for cand in (1024, 512, 256, 128, 64, 32, 16, 8):
        if cand * bytes_per_row <= _VMEM_INPUT_BUDGET:
            tile_r = cand
            break
    tile_r = min(tile_r, rows)         # never tile beyond the (rounded) data

    # Always engage the 2-TC megacore split (v7x); on 1-TC chips the parallel
    # axis is just an outer loop and the padded zero tile contributes 0.
    n_par = 2
    R = ((rows + n_par * tile_r - 1) // (n_par * tile_r)) * (n_par * tile_r)
    n_pad_rows = R * _LANES
    num_tiles = R // tile_r
    tiles_per_core = num_tiles // n_par

    # ---- field-major, lane-dense layout: (N, D) -> (d_keep, R, 128) --------
    def to_field_major(x, d_keep):
        # Slice BEFORE pad/transpose so unused label fields never move.
        x2 = x.reshape(N, -1)[:, :d_keep].astype(jnp.float32)
        # Zero padding keeps the loss exact: pad rows have obj = 0 and both
        # predicted confidences = 0, so every term contributes exactly 0.
        x2 = jnp.pad(x2, ((0, n_pad_rows - N), (0, 0)))
        return x2.T.reshape(d_keep, R, _LANES)

    pred_fm = to_field_major(pred, D)
    label_fm = to_field_major(label, D_LAB)

    idx_map = lambda p, t: (0, p * tiles_per_core + t, 0)
    pred_spec = pl.BlockSpec((D, tile_r, _LANES), idx_map)
    label_spec = pl.BlockSpec((D_LAB, tile_r, _LANES), idx_map)
    out_spec = pl.BlockSpec((tile_r, _LANES), lambda p, t: (p, 0))

    kernel = functools.partial(_yolo_loss_kernel, C=C)
    partial_sums = pl.pallas_call(
        kernel,
        grid=(n_par, tiles_per_core),
        in_specs=[pred_spec, label_spec],
        out_specs=out_spec,
        out_shape=jax.ShapeDtypeStruct((n_par * tile_r, _LANES), jnp.float32),
        compiler_params=pltpu.CompilerParams(
            dimension_semantics=("parallel", "arbitrary"),
            vmem_limit_bytes=_VMEM_LIMIT_BYTES),
    )(pred_fm, label_fm)

    # One cross-lane reduce + batch normalization outside the kernel.
    return jnp.sum(partial_sums) / b_s


# ----------------------------- pure-JAX reference ---------------------------
def _iou_xywh(box_a, box_b):
    ax1 = box_a[:, 0:1] - box_a[:, 2:3] * 0.5
    ay1 = box_a[:, 1:2] - box_a[:, 3:4] * 0.5
    ax2 = box_a[:, 0:1] + box_a[:, 2:3] * 0.5
    ay2 = box_a[:, 1:2] + box_a[:, 3:4] * 0.5

    bx1 = box_b[:, 0:1] - box_b[:, 2:3] * 0.5
    by1 = box_b[:, 1:2] - box_b[:, 3:4] * 0.5
    bx2 = box_b[:, 0:1] + box_b[:, 2:3] * 0.5
    by2 = box_b[:, 1:2] + box_b[:, 3:4] * 0.5

    ix1 = jnp.maximum(ax1, bx1)
    iy1 = jnp.maximum(ay1, by1)
    ix2 = jnp.minimum(ax2, bx2)
    iy2 = jnp.minimum(ay2, by2)

    inter = jnp.maximum(ix2 - ix1, 0.0) * jnp.maximum(iy2 - iy1, 0.0)
    area_a = jnp.abs((ax2 - ax1) * (ay2 - ay1))
    area_b = jnp.abs((bx2 - bx1) * (by2 - by1))
    return inter / (area_a + area_b - inter + 1e-6)


def yolo_loss_reference(pred, label, cfg: YOLOConfig):
    """Pure-JAX reference mirroring the PyTorch forward exactly."""
    C = cfg.C
    b_s = pred.shape[0]
    pred = pred.reshape(-1, cfg.CELL_NODES).astype(jnp.float32)
    label = label.reshape(-1, cfg.CELL_NODES).astype(jnp.float32)

    pred_cls, label_cls = pred[:, :C], label[:, :C]
    p1_pc, p1 = pred[:, C:C + 1], pred[:, C + 1:C + 5]
    p2_pc, p2 = pred[:, C + 5:C + 6], pred[:, C + 6:C + 10]
    l_pc, l_box = label[:, C:C + 1], label[:, C + 1:C + 5]

    iou1, iou2 = _iou_xywh(p1, l_box), _iou_xywh(p2, l_box)
    best1 = iou1 >= iou2
    best_xywh = jnp.where(best1, p1, p2)
    best_pc = jnp.where(best1, p1_pc, p2_pc)
    best_iou = jnp.where(best1, iou1, iou2)

    obj, noobj = l_pc, 1.0 - l_pc
    mse = lambda a, b: jnp.sum((a - b) ** 2)
    coord = mse(obj * best_xywh[:, :2], obj * l_box[:, :2])
    coord += mse(obj * jnp.sqrt(jnp.maximum(best_xywh[:, 2:4], 1e-6)),
                 obj * jnp.sqrt(l_box[:, 2:4]))
    conf = mse(obj * best_pc, obj * best_iou)
    noobj_l = mse(noobj * jnp.concatenate([p1_pc, p2_pc], -1), 0.0)
    cls = mse(obj * pred_cls, obj * label_cls)
    return (LAMBDA_COORD * coord + conf + LAMBDA_NOOBJ * noobj_l + cls) / b_s


if __name__ == "__main__":
    cfg = YOLOConfig(S=4, B=2, C=4)
    batch = 2
    D = cfg.CELL_NODES  # 14

    key = jax.random.PRNGKey(0)
    k_pred, k_cls, k_pc, k_box = jax.random.split(key, 4)

    # predictions: arbitrary reals (as a raw network head would emit)
    pred = jax.random.normal(k_pred, (batch, cfg.S, cfg.S, D), jnp.float32)

    # labels: soft classes, binary objectness, boxes in [0, 1]
    label_cls = jax.random.uniform(k_cls, (batch, cfg.S, cfg.S, cfg.C))
    label_pc = (jax.random.uniform(k_pc, (batch, cfg.S, cfg.S, 1)) > 0.5
                ).astype(jnp.float32)
    label_box = jax.random.uniform(k_box, (batch, cfg.S, cfg.S, 4))
    pad = jnp.zeros((batch, cfg.S, cfg.S, D - cfg.C - 5), jnp.float32)
    label = jnp.concatenate([label_cls, label_pc, label_box, pad], axis=-1)

    loss = yolo_loss(pred, label, cfg)
    loss = jax.block_until_ready(loss)

    ref = yolo_loss_reference(pred, label, cfg)
    assert jnp.allclose(loss, ref, rtol=1e-4, atol=1e-4), (loss, ref)

    print("KERNEL_OK")
</pallas_src>

<mosaic_0001>
module attributes {stable_mosaic.version = 11 : i64} {
  func.func @_yolo_loss_kernel(%arg0: i32, %arg1: i32, %arg2: memref<14x8x128xf32, #tpu.memory_space<vmem>>, %arg3: memref<9x8x128xf32, #tpu.memory_space<vmem>>, %arg4: memref<8x128xf32, #tpu.memory_space<vmem>>) attributes {dimension_semantics = [#tpu.dimension_semantics<parallel>, #tpu.dimension_semantics<arbitrary>], iteration_bounds = array<i64: 2, 1>, scalar_prefetch = 0 : i64, scratch_operands = 0 : i64, tpu.core_type = #tpu.core_type<tc>, window_params = [{transform_indices = @transform_0, window_bounds = array<i64: 14, 8, 128>}, {transform_indices = @transform_1, window_bounds = array<i64: 9, 8, 128>}, {transform_indices = @transform_2, window_bounds = array<i64: 8, 128>}]} {
    %c0_i32 = arith.constant 0 : i32
    %0 = arith.cmpi eq, %arg1, %c0_i32 : i32
    %1 = arith.extui %0 : i1 to i32
    %c0_i32_0 = arith.constant 0 : i32
    %2 = arith.cmpi ne, %1, %c0_i32_0 : i32
    scf.if %2 {
      %cst_83 = arith.constant 0.000000e+00 : f32
      %198 = vector.broadcast %cst_83 : f32 to vector<8x128xf32>
      %c0_84 = arith.constant 0 : index
      %c0_85 = arith.constant 0 : index
      %199 = vector.load %arg4[%c0_84, %c0_85] : memref<8x128xf32, #tpu.memory_space<vmem>>, vector<8x128xf32>
      tpu.vector_store %arg4[%c0_84, %c0_85], %198 {strides = array<i32>} : memref<8x128xf32, #tpu.memory_space<vmem>>, vector<8x128xf32>,
    } else {
    }
    %c4 = arith.constant 4 : index
    %c0 = arith.constant 0 : index
    %c0_1 = arith.constant 0 : index
    %3 = vector.load %arg2[%c4, %c0, %c0_1] : memref<14x8x128xf32, #tpu.memory_space<vmem>>, vector<1x8x128xf32>
    %4 = vector.shape_cast %3 : vector<1x8x128xf32> to vector<8x128xf32>
    %c5 = arith.constant 5 : index
    %c0_2 = arith.constant 0 : index
    %c0_3 = arith.constant 0 : index
    %5 = vector.load %arg2[%c5, %c0_2, %c0_3] : memref<14x8x128xf32, #tpu.memory_space<vmem>>, vector<1x8x128xf32>
    %6 = vector.shape_cast %5 : vector<1x8x128xf32> to vector<8x128xf32>
    %c6 = arith.constant 6 : index
    %c0_4 = arith.constant 0 : index
    %c0_5 = arith.constant 0 : index
    %7 = vector.load %arg2[%c6, %c0_4, %c0_5] : memref<14x8x128xf32, #tpu.memory_space<vmem>>, vector<1x8x128xf32>
    %8 = vector.shape_cast %7 : vector<1x8x128xf32> to vector<8x128xf32>
    %c7 = arith.constant 7 : index
    %c0_6 = arith.constant 0 : index
    %c0_7 = arith.constant 0 : index
    %9 = vector.load %arg2[%c7, %c0_6, %c0_7] : memref<14x8x128xf32, #tpu.memory_space<vmem>>, vector<1x8x128xf32>
    %10 = vector.shape_cast %9 : vector<1x8x128xf32> to vector<8x128xf32>
    %c8 = arith.constant 8 : index
    %c0_8 = arith.constant 0 : index
    %c0_9 = arith.constant 0 : index
    %11 = vector.load %arg2[%c8, %c0_8, %c0_9] : memref<14x8x128xf32, #tpu.memory_space<vmem>>, vector<1x8x128xf32>
    %12 = vector.shape_cast %11 : vector<1x8x128xf32> to vector<8x128xf32>
    %c9 = arith.constant 9 : index
    %c0_10 = arith.constant 0 : index
    %c0_11 = arith.constant 0 : index
    %13 = vector.load %arg2[%c9, %c0_10, %c0_11] : memref<14x8x128xf32, #tpu.memory_space<vmem>>, vector<1x8x128xf32>
    %14 = vector.shape_cast %13 : vector<1x8x128xf32> to vector<8x128xf32>
    %c10 = arith.constant 10 : index
    %c0_12 = arith.constant 0 : index
    %c0_13 = arith.constant 0 : index
    %15 = vector.load %arg2[%c10, %c0_12, %c0_13] : memref<14x8x128xf32, #tpu.memory_space<vmem>>, vector<1x8x128xf32>
    %16 = vector.shape_cast %15 : vector<1x8x128xf32> to vector<8x128xf32>
    %c11 = arith.constant 11 : index
    %c0_14 = arith.constant 0 : index
    %c0_15 = arith.constant 0 : index
    %17 = vector.load %arg2[%c11, %c0_14, %c0_15] : memref<14x8x128xf32, #tpu.memory_space<vmem>>, vector<1x8x128xf32>
    %18 = vector.shape_cast %17 : vector<1x8x128xf32> to vector<8x128xf32>
    %c12 = arith.constant 12 : index
    %c0_16 = arith.constant 0 : index
    %c0_17 = arith.constant 0 : index
    %19 = vector.load %arg2[%c12, %c0_16, %c0_17] : memref<14x8x128xf32, #tpu.memory_space<vmem>>, vector<1x8x128xf32>
    %20 = vector.shape_cast %19 : vector<1x8x128xf32> to vector<8x128xf32>
    %c13 = arith.constant 13 : index
    %c0_18 = arith.constant 0 : index
    %c0_19 = arith.constant 0 : index
    %21 = vector.load %arg2[%c13, %c0_18, %c0_19] : memref<14x8x128xf32, #tpu.memory_space<vmem>>, vector<1x8x128xf32>
    %22 = vector.shape_cast %21 : vector<1x8x128xf32> to vector<8x128xf32>
    %c4_20 = arith.constant 4 : index
    %c0_21 = arith.constant 0 : index
    %c0_22 = arith.constant 0 : index
    %23 = vector.load %arg3[%c4_20, %c0_21, %c0_22] : memref<9x8x128xf32, #tpu.memory_space<vmem>>, vector<1x8x128xf32>
    %24 = vector.shape_cast %23 : vector<1x8x128xf32> to vector<8x128xf32>
    %c5_23 = arith.constant 5 : index
    %c0_24 = arith.constant 0 : index
    %c0_25 = arith.constant 0 : index
    %25 = vector.load %arg3[%c5_23, %c0_24, %c0_25] : memref<9x8x128xf32, #tpu.memory_space<vmem>>, vector<1x8x128xf32>
    %26 = vector.shape_cast %25 : vector<1x8x128xf32> to vector<8x128xf32>
    %c6_26 = arith.constant 6 : index
    %c0_27 = arith.constant 0 : index
    %c0_28 = arith.constant 0 : index
    %27 = vector.load %arg3[%c6_26, %c0_27, %c0_28] : memref<9x8x128xf32, #tpu.memory_space<vmem>>, vector<1x8x128xf32>
    %28 = vector.shape_cast %27 : vector<1x8x128xf32> to vector<8x128xf32>
    %c7_29 = arith.constant 7 : index
    %c0_30 = arith.constant 0 : index
    %c0_31 = arith.constant 0 : index
    %29 = vector.load %arg3[%c7_29, %c0_30, %c0_31] : memref<9x8x128xf32, #tpu.memory_space<vmem>>, vector<1x8x128xf32>
    %30 = vector.shape_cast %29 : vector<1x8x128xf32> to vector<8x128xf32>
    %c8_32 = arith.constant 8 : index
    %c0_33 = arith.constant 0 : index
    %c0_34 = arith.constant 0 : index
    %31 = vector.load %arg3[%c8_32, %c0_33, %c0_34] : memref<9x8x128xf32, #tpu.memory_space<vmem>>, vector<1x8x128xf32>
    %32 = vector.shape_cast %31 : vector<1x8x128xf32> to vector<8x128xf32>
    %cst = arith.constant 5.000000e-01 : f32
    %33 = vector.broadcast %cst : f32 to vector<8x128xf32>
    %34 = arith.mulf %30, %33 : vector<8x128xf32>
    %35 = arith.subf %26, %34 : vector<8x128xf32>
    %cst_35 = arith.constant 5.000000e-01 : f32
    %36 = vector.broadcast %cst_35 : f32 to vector<8x128xf32>
    %37 = arith.mulf %32, %36 : vector<8x128xf32>
    %38 = arith.subf %28, %37 : vector<8x128xf32>
    %cst_36 = arith.constant 5.000000e-01 : f32
    %39 = vector.broadcast %cst_36 : f32 to vector<8x128xf32>
    %40 = arith.mulf %30, %39 : vector<8x128xf32>
    %41 = arith.addf %26, %40 : vector<8x128xf32>
    %cst_37 = arith.constant 5.000000e-01 : f32
    %42 = vector.broadcast %cst_37 : f32 to vector<8x128xf32>
    %43 = arith.mulf %32, %42 : vector<8x128xf32>
    %44 = arith.addf %28, %43 : vector<8x128xf32>
    %45 = arith.subf %41, %35 : vector<8x128xf32>
    %46 = arith.subf %44, %38 : vector<8x128xf32>
    %47 = arith.mulf %45, %46 : vector<8x128xf32>
    %48 = math.absf %47 : vector<8x128xf32>
    %cst_38 = arith.constant 5.000000e-01 : f32
    %49 = vector.broadcast %cst_38 : f32 to vector<8x128xf32>
    %50 = arith.mulf %10, %49 : vector<8x128xf32>
    %51 = arith.subf %6, %50 : vector<8x128xf32>
    %cst_39 = arith.constant 5.000000e-01 : f32
    %52 = vector.broadcast %cst_39 : f32 to vector<8x128xf32>
    %53 = arith.mulf %12, %52 : vector<8x128xf32>
    %54 = arith.subf %8, %53 : vector<8x128xf32>
    %cst_40 = arith.constant 5.000000e-01 : f32
    %55 = vector.broadcast %cst_40 : f32 to vector<8x128xf32>
    %56 = arith.mulf %10, %55 : vector<8x128xf32>
    %57 = arith.addf %6, %56 : vector<8x128xf32>
    %cst_41 = arith.constant 5.000000e-01 : f32
    %58 = vector.broadcast %cst_41 : f32 to vector<8x128xf32>
    %59 = arith.mulf %12, %58 : vector<8x128xf32>
    %60 = arith.addf %8, %59 : vector<8x128xf32>
    %61 = arith.maximumf %51, %35 : vector<8x128xf32>
    %62 = arith.maximumf %54, %38 : vector<8x128xf32>
    %63 = arith.minimumf %57, %41 : vector<8x128xf32>
    %64 = arith.minimumf %60, %44 : vector<8x128xf32>
    %65 = arith.subf %63, %61 : vector<8x128xf32>
    %cst_42 = arith.constant 0.000000e+00 : f32
    %66 = vector.broadcast %cst_42 : f32 to vector<8x128xf32>
    %67 = arith.maximumf %65, %66 : vector<8x128xf32>
    %68 = arith.subf %64, %62 : vector<8x128xf32>
    %cst_43 = arith.constant 0.000000e+00 : f32
    %69 = vector.broadcast %cst_43 : f32 to vector<8x128xf32>
    %70 = arith.maximumf %68, %69 : vector<8x128xf32>
    %71 = arith.mulf %67, %70 : vector<8x128xf32>
    %72 = arith.subf %57, %51 : vector<8x128xf32>
    %73 = arith.subf %60, %54 : vector<8x128xf32>
    %74 = arith.mulf %72, %73 : vector<8x128xf32>
    %75 = math.absf %74 : vector<8x128xf32>
    %76 = arith.addf %75, %48 : vector<8x128xf32>
    %77 = arith.subf %76, %71 : vector<8x128xf32>
    %cst_44 = arith.constant 9.99999997E-7 : f32
    %78 = vector.broadcast %cst_44 : f32 to vector<8x128xf32>
    %79 = arith.addf %77, %78 : vector<8x128xf32>
    %cst_45 = arith.constant 5.000000e-01 : f32
    %80 = vector.broadcast %cst_45 : f32 to vector<8x128xf32>
    %81 = arith.mulf %20, %80 : vector<8x128xf32>
    %82 = arith.subf %16, %81 : vector<8x128xf32>
    %cst_46 = arith.constant 5.000000e-01 : f32
    %83 = vector.broadcast %cst_46 : f32 to vector<8x128xf32>
    %84 = arith.mulf %22, %83 : vector<8x128xf32>
    %85 = arith.subf %18, %84 : vector<8x128xf32>
    %cst_47 = arith.constant 5.000000e-01 : f32
    %86 = vector.broadcast %cst_47 : f32 to vector<8x128xf32>
    %87 = arith.mulf %20, %86 : vector<8x128xf32>
    %88 = arith.addf %16, %87 : vector<8x128xf32>
    %cst_48 = arith.constant 5.000000e-01 : f32
    %89 = vector.broadcast %cst_48 : f32 to vector<8x128xf32>
    %90 = arith.mulf %22, %89 : vector<8x128xf32>
    %91 = arith.addf %18, %90 : vector<8x128xf32>
    %92 = arith.maximumf %82, %35 : vector<8x128xf32>
    %93 = arith.maximumf %85, %38 : vector<8x128xf32>
    %94 = arith.minimumf %88, %41 : vector<8x128xf32>
    %95 = arith.minimumf %91, %44 : vector<8x128xf32>
    %96 = arith.subf %94, %92 : vector<8x128xf32>
    %cst_49 = arith.constant 0.000000e+00 : f32
    %97 = vector.broadcast %cst_49 : f32 to vector<8x128xf32>
    %98 = arith.maximumf %96, %97 : vector<8x128xf32>
    %99 = arith.subf %95, %93 : vector<8x128xf32>
    %cst_50 = arith.constant 0.000000e+00 : f32
    %100 = vector.broadcast %cst_50 : f32 to vector<8x128xf32>
    %101 = arith.maximumf %99, %100 : vector<8x128xf32>
    %102 = arith.mulf %98, %101 : vector<8x128xf32>
    %103 = arith.subf %88, %82 : vector<8x128xf32>
    %104 = arith.subf %91, %85 : vector<8x128xf32>
    %105 = arith.mulf %103, %104 : vector<8x128xf32>
    %106 = math.absf %105 : vector<8x128xf32>
    %107 = arith.addf %106, %48 : vector<8x128xf32>
    %108 = arith.subf %107, %102 : vector<8x128xf32>
    %cst_51 = arith.constant 9.99999997E-7 : f32
    %109 = vector.broadcast %cst_51 : f32 to vector<8x128xf32>
    %110 = arith.addf %108, %109 : vector<8x128xf32>
    %111 = arith.mulf %71, %110 : vector<8x128xf32>
    %112 = arith.mulf %102, %79 : vector<8x128xf32>
    %113 = arith.cmpf oge, %111, %112 : vector<8x128xf32>
    %114 = arith.select %113, %6, %16 : vector<8x128xi1>, vector<8x128xf32>
    %115 = arith.select %113, %8, %18 : vector<8x128xi1>, vector<8x128xf32>
    %116 = arith.select %113, %10, %20 : vector<8x128xi1>, vector<8x128xf32>
    %117 = arith.select %113, %12, %22 : vector<8x128xi1>, vector<8x128xf32>
    %118 = arith.select %113, %4, %14 : vector<8x128xi1>, vector<8x128xf32>
    %119 = arith.select %113, %71, %102 : vector<8x128xi1>, vector<8x128xf32>
    %120 = arith.select %113, %79, %110 : vector<8x128xi1>, vector<8x128xf32>
    %121 = arith.divf %119, %120 : vector<8x128xf32>
    %cst_52 = arith.constant 1.000000e+00 : f32
    %122 = vector.broadcast %cst_52 : f32 to vector<8x128xf32>
    %123 = arith.subf %122, %24 : vector<8x128xf32>
    %124 = arith.subf %114, %26 : vector<8x128xf32>
    %125 = arith.mulf %24, %124 : vector<8x128xf32>
    %126 = arith.subf %115, %28 : vector<8x128xf32>
    %127 = arith.mulf %24, %126 : vector<8x128xf32>
    %cst_53 = arith.constant 9.99999997E-7 : f32
    %128 = vector.broadcast %cst_53 : f32 to vector<8x128xf32>
    %129 = arith.maximumf %116, %128 : vector<8x128xf32>
    %130 = math.sqrt %129 : vector<8x128xf32>
    %131 = math.sqrt %30 : vector<8x128xf32>
    %132 = arith.subf %130, %131 : vector<8x128xf32>
    %133 = arith.mulf %24, %132 : vector<8x128xf32>
    %cst_54 = arith.constant 9.99999997E-7 : f32
    %134 = vector.broadcast %cst_54 : f32 to vector<8x128xf32>
    %135 = arith.maximumf %117, %134 : vector<8x128xf32>
    %136 = math.sqrt %135 : vector<8x128xf32>
    %137 = math.sqrt %32 : vector<8x128xf32>
    %138 = arith.subf %136, %137 : vector<8x128xf32>
    %139 = arith.mulf %24, %138 : vector<8x128xf32>
    %140 = arith.subf %118, %121 : vector<8x128xf32>
    %141 = arith.mulf %24, %140 : vector<8x128xf32>
    %142 = arith.mulf %123, %4 : vector<8x128xf32>
    %143 = arith.mulf %123, %14 : vector<8x128xf32>
    %cst_55 = arith.constant 0.000000e+00 : f32
    %144 = vector.broadcast %cst_55 : f32 to vector<8x128xf32>
    %c0_56 = arith.constant 0 : index
    %c0_57 = arith.constant 0 : index
    %c0_58 = arith.constant 0 : index
    %145 = vector.load %arg2[%c0_56, %c0_57, %c0_58] : memref<14x8x128xf32, #tpu.memory_space<vmem>>, vector<1x8x128xf32>
    %146 = vector.shape_cast %145 : vector<1x8x128xf32> to vector<8x128xf32>
    %c0_59 = arith.constant 0 : index
    %c0_60 = arith.constant 0 : index
    %c0_61 = arith.constant 0 : index
    %147 = vector.load %arg3[%c0_59, %c0_60, %c0_61] : memref<9x8x128xf32, #tpu.memory_space<vmem>>, vector<1x8x128xf32>
    %148 = vector.shape_cast %147 : vector<1x8x128xf32> to vector<8x128xf32>
    %149 = arith.subf %146, %148 : vector<8x128xf32>
    %150 = arith.mulf %24, %149 : vector<8x128xf32>
    %151 = arith.mulf %150, %150 : vector<8x128xf32>
    %152 = arith.addf %144, %151 : vector<8x128xf32>
    %c1 = arith.constant 1 : index
    %c0_62 = arith.constant 0 : index
    %c0_63 = arith.constant 0 : index
    %153 = vector.load %arg2[%c1, %c0_62, %c0_63] : memref<14x8x128xf32, #tpu.memory_space<vmem>>, vector<1x8x128xf32>
    %154 = vector.shape_cast %153 : vector<1x8x128xf32> to vector<8x128xf32>
    %c1_64 = arith.constant 1 : index
    %c0_65 = arith.constant 0 : index
    %c0_66 = arith.constant 0 : index
    %155 = vector.load %arg3[%c1_64, %c0_65, %c0_66] : memref<9x8x128xf32, #tpu.memory_space<vmem>>, vector<1x8x128xf32>
    %156 = vector.shape_cast %155 : vector<1x8x128xf32> to vector<8x128xf32>
    %157 = arith.subf %154, %156 : vector<8x128xf32>
    %158 = arith.mulf %24, %157 : vector<8x128xf32>
    %159 = arith.mulf %158, %158 : vector<8x128xf32>
    %160 = arith.addf %152, %159 : vector<8x128xf32>
    %c2 = arith.constant 2 : index
    %c0_67 = arith.constant 0 : index
    %c0_68 = arith.constant 0 : index
    %161 = vector.load %arg2[%c2, %c0_67, %c0_68] : memref<14x8x128xf32, #tpu.memory_space<vmem>>, vector<1x8x128xf32>
    %162 = vector.shape_cast %161 : vector<1x8x128xf32> to vector<8x128xf32>
    %c2_69 = arith.constant 2 : index
    %c0_70 = arith.constant 0 : index
    %c0_71 = arith.constant 0 : index
    %163 = vector.load %arg3[%c2_69, %c0_70, %c0_71] : memref<9x8x128xf32, #tpu.memory_space<vmem>>, vector<1x8x128xf32>
    %164 = vector.shape_cast %163 : vector<1x8x128xf32> to vector<8x128xf32>
    %165 = arith.subf %162, %164 : vector<8x128xf32>
    %166 = arith.mulf %24, %165 : vector<8x128xf32>
    %167 = arith.mulf %166, %166 : vector<8x128xf32>
    %168 = arith.addf %160, %167 : vector<8x128xf32>
    %c3 = arith.constant 3 : index
    %c0_72 = arith.constant 0 : index
    %c0_73 = arith.constant 0 : index
    %169 = vector.load %arg2[%c3, %c0_72, %c0_73] : memref<14x8x128xf32, #tpu.memory_space<vmem>>, vector<1x8x128xf32>
    %170 = vector.shape_cast %169 : vector<1x8x128xf32> to vector<8x128xf32>
    %c3_74 = arith.constant 3 : index
    %c0_75 = arith.constant 0 : index
    %c0_76 = arith.constant 0 : index
    %171 = vector.load %arg3[%c3_74, %c0_75, %c0_76] : memref<9x8x128xf32, #tpu.memory_space<vmem>>, vector<1x8x128xf32>
    %172 = vector.shape_cast %171 : vector<1x8x128xf32> to vector<8x128xf32>
    %173 = arith.subf %170, %172 : vector<8x128xf32>
    %174 = arith.mulf %24, %173 : vector<8x128xf32>
    %175 = arith.mulf %174, %174 : vector<8x128xf32>
    %176 = arith.addf %168, %175 : vector<8x128xf32>
    %177 = arith.mulf %125, %125 : vector<8x128xf32>
    %178 = arith.mulf %127, %127 : vector<8x128xf32>
    %179 = arith.addf %177, %178 : vector<8x128xf32>
    %180 = arith.mulf %133, %133 : vector<8x128xf32>
    %181 = arith.addf %179, %180 : vector<8x128xf32>
    %182 = arith.mulf %139, %139 : vector<8x128xf32>
    %183 = arith.addf %181, %182 : vector<8x128xf32>
    %cst_77 = arith.constant 5.000000e+00 : f32
    %184 = vector.broadcast %cst_77 : f32 to vector<8x128xf32>
    %185 = arith.mulf %184, %183 : vector<8x128xf32>
    %186 = arith.mulf %141, %141 : vector<8x128xf32>
    %187 = arith.addf %185, %186 : vector<8x128xf32>
    %188 = arith.mulf %142, %142 : vector<8x128xf32>
    %189 = arith.mulf %143, %143 : vector<8x128xf32>
    %190 = arith.addf %188, %189 : vector<8x128xf32>
    %cst_78 = arith.constant 5.000000e-01 : f32
    %191 = vector.broadcast %cst_78 : f32 to vector<8x128xf32>
    %192 = arith.mulf %191, %190 : vector<8x128xf32>
    %193 = arith.addf %187, %192 : vector<8x128xf32>
    %194 = arith.addf %193, %176 : vector<8x128xf32>
    %c0_79 = arith.constant 0 : index
    %c0_80 = arith.constant 0 : index
    %195 = vector.load %arg4[%c0_79, %c0_80] : memref<8x128xf32, #tpu.memory_space<vmem>>, vector<8x128xf32>
    %196 = arith.addf %195, %194 : vector<8x128xf32>
    %c0_81 = arith.constant 0 : index
    %c0_82 = arith.constant 0 : index
    %197 = vector.load %arg4[%c0_81, %c0_82] : memref<8x128xf32, #tpu.memory_space<vmem>>, vector<8x128xf32>
    tpu.vector_store %arg4[%c0_81, %c0_82], %196 {strides = array<i32>} : memref<8x128xf32, #tpu.memory_space<vmem>>, vector<8x128xf32>,
    return
  }
  func.func @transform_0(%arg0: i32, %arg1: i32) -> (i32, i32, i32) {
    %c1_i32 = arith.constant 1 : i32
    %0 = arith.muli %arg0, %c1_i32 : i32
    %1 = arith.addi %0, %arg1 : i32
    %c0_i32 = arith.constant 0 : i32
    %c0_i32_0 = arith.constant 0 : i32
    %c0_i32_1 = arith.constant 0 : i32
    return %c0_i32, %1, %c0_i32_0 : i32, i32, i32
  }
  func.func @transform_1(%arg0: i32, %arg1: i32) -> (i32, i32, i32) {
    %c1_i32 = arith.constant 1 : i32
    %0 = arith.muli %arg0, %c1_i32 : i32
    %1 = arith.addi %0, %arg1 : i32
    %c0_i32 = arith.constant 0 : i32
    %c0_i32_0 = arith.constant 0 : i32
    %c0_i32_1 = arith.constant 0 : i32
    return %c0_i32, %1, %c0_i32_0 : i32, i32, i32
  }
  func.func @transform_2(%arg0: i32, %arg1: i32) -> (i32, i32) {
    %c0_i32 = arith.constant 0 : i32
    %c0_i32_0 = arith.constant 0 : i32
    return %arg0, %c0_i32 : i32, i32
  }
}

</mosaic_0001>

<bundles_post_ra>
// kernel: tpu_custom_call.1
= control target key start
LH: loop header
LB: loop body
LE: loop exit
PB: predicated region body
PF: predicated region fallthrough
CT: control target
= control target key end

     0   :  { %s1136_s0 = inlined_call_operand.hbm [shape: f32[14,16,128], index: 0, kind: input, shape index: {}]   ;;  %s1137_s1 = inlined_call_operand.hbm [shape: f32[9,16,128], index: 1, kind: input, shape index: {}]   ;;  %s1138_s2 = inlined_call_operand.hbm [shape: f32[16,128], index: 2, kind: output, shape index: {}]  }
   0x1   :  { %1139 = sst [smem:[#allocation11_spill]] %s1136_s0 }
   0x2   :  { %7 = vsyncpa [#allocation3], 0 }
   0x3   :  { %9 = vsyncpa [#allocation3 + $0x1], 0 }
   0x4   :  { %10 = vsyncpa [#allocation6], 0 }
   0x5   :  { %12 = vsyncpa [#allocation6 + $0x1], 0 }
   0x6   :  { %13 = vsyncpa [#allocation4], 0 }
   0x7   :  { %15 = vsyncpa [#allocation4 + $0x1], 0  ;;  %s811_s9 = smov 0   ;;  %s813_s10 = smov 0  }
   0x8   :  { %s815_s11 = smov 0   ;;  %s817_s12 = smov 0  }
   0x9   :  { %s819_s13 = smov 0   ;;  %s821_s14 = smov 0  }
   0xa LB: > { %s530_s15 = sadd.s32 4294967295, %s788_s14   ;;  %s531_s16 = sadd.s32 4294967294, %s788_s14   ;;  %s788_s14 = sphi %s821_s14, %s21_s14   ;;  %s784_s13 = sphi %s819_s13, %s1154_s13   ;;  %s780_s12 = sphi %s817_s12, %s1153_s12   ;;  %s776_s11 = sphi %s815_s11, %s1152_s11   ;;  %s772_s10 = sphi %s813_s10, %s1151_s10   ;;  %s768_s9 = sphi %s811_s9, %s1150_s9  }
   0xb   : > { %s33_s17 = sadd.s32 1, %s784_s13  ;;  %s42_s18 = sadd.s32 1, %s776_s11 }
   0xc   : > { %p35_p0 = scmp.ge.s32.totalorder %s33_s17, 2  ;;  %p49_p1 = scmp.ne.s32.totalorder %s776_s11, %s772_s10 }
   0xd   : > { %p50_p2 = scmp.eq.s32.totalorder %s788_s14, 0  ;;  %p55_p3 = scmp.ne.s32.totalorder %s772_s10, %s768_s9 }
   0xe   : > { %s1156_s17 = smov (%p35_p0, %s33_s17), 0  ;;  %p56_p5 = scmp.eq.s32.totalorder %s530_s15, 0 }
   0xf   : > { %p852_p4 = por %p50_p2, %p49_p1  ;;  %s39_s20 = ssub.s32 %s784_s13, %s1156_s17 }
  0x10   : > { %p107_p6 = scmp.eq.s32.totalorder %s530_s15, 1  ;;  %p40_p7 = scmp.eq.s32.totalorder %s39_s20, 0 }
  0x11   : > { %p858_p8 = por %p56_p5, %p55_p3  ;;  %p113_p10 = scmp.eq.s32.totalorder %s531_s16, 1 }
  0x12   : > { %p862_p9 = por %p107_p6, %p49_p1  ;;  %p584_p13 = scmp.lt.s32.totalorder %s788_s14, 2 }
  0x13   : > { %s867_s23 = scalar_select %p40_p7, %s776_s11, %s42_s18  }
  0x14   : > { %p869_p11 = por %p113_p10, %p55_p3  ;;  %s876_s25 = sand.u32 1, %s776_s11  }
  0x15   : > { %s563_s26 = smul.u32 112, %s876_s25  ;;  %s534_s27 = sshll.u32 %s784_s13, 7 }
  0x16   : > { %p882_p0 = pnand %p584_p13, %p852_p4  ;;  %s1145_s0 = sld [smem:[#allocation11_spill]] }
  0x17   : > { %s137_s4 = scalar_lea.vmem [#allocation2], %s563_s26  ;;  %s134_s6 = scalar_lea.sflag [#allocation3], %s876_s25 }
  0x18   : > { %s144_s5 = sshll.u32 %s137_s4, 4  ;;  %p650_p1 = pneg %p882_p0  ;;  %s145_s5 = int_to_ptr.vmem [resolvable:$true] %s144_s5 }
  0x19   : > { %s661_s7 = scalar_lea.vmem %s145_s5, 1792  ;;  %s790_s8 = smov [#allocation2]  }
  0x1a   : > { %p662_p2 = scmp.ne.s32.totalorder %s145_s5, %s661_s7  ;;  %s666_s15 = sshll.u32 %s790_s8, 4  ;;  %s667_s15 = int_to_ptr.vmem [resolvable:$false] %s666_s15 }
  0x1b   : > { %s668_s16 = scalar_lea.vmem %s667_s15, 3584  ;;  %p669_p5 = scmp.lt.s32.totalorder %s145_s5, %s667_s15 }
  0x1c   : > { %s143_s3 = scalar_lea.hbm %s1145_s0, %s534_s27  ;;  %p664_p3 = pnand %p662_p2, %p650_p1 }
  0x1d   : > { %p670_p6 = scmp.lt.s32.totalorder %s668_s16, %s661_s7 }
  0x1e   : > { %p665_p4 = pneg %p664_p3 }
  0x1f   : > { %p671_p7 = por %p670_p6, %p669_p5 }
  0x21   : > { %p672_p10 = pnand %p671_p7, %p665_p4 }
  0x23   : > { %675 = shalt.err (!%p672_p10)
}
  0x24   : > { %s791_s18 = smov 256   ;;  %s792_s19 = smov 128  }
  0x25   : > { %s793_s20 = smov 8   ;;  %p536_p13 = scmp.ge.s32.totalorder %s788_s14, 1 }
  0x26   : > { %576 = dma.hbm_to_vmem [thread:$0]  (!%p882_p0), %s143_s3, 1792, %s145_s5, %s134_s6, %s791_s18, %s792_s19, %s793_s20  }
  0x27   : > { %p173_p2 = scmp.lt.s32.totalorder %s788_s14, 3  ;;  %s564_s26 = smul.u32 72, %s876_s25 }
  0x28   : > { %s164_s7 = scalar_lea.hbm %s1137_s1, %s534_s27  ;;  %s155_s16 = scalar_lea.sflag [#allocation6], %s876_s25 }
  0x29   : > { %p904_p3 = pnand %p536_p13, %p173_p2  ;;  %s158_s8 = scalar_lea.vmem [#allocation5], %s564_s26 }
  0x2a   : > { %s165_s15 = sshll.u32 %s158_s8, 4  ;;  %s794_s3 = smov [#allocation5]   ;;  %s166_s15 = int_to_ptr.vmem [resolvable:$true] %s165_s15 }
  0x2b   : > { %s689_s0 = scalar_lea.vmem %s166_s15, 1152  ;;  %s694_s5 = sshll.u32 %s794_s3, 4  ;;  %s695_s5 = int_to_ptr.vmem [resolvable:$false] %s694_s5 }
  0x2c   : > { %p690_p4 = scmp.ne.s32.totalorder %s166_s15, %s689_s0  ;;  %s696_s6 = scalar_lea.vmem %s695_s5, 2304 }
  0x2d   : > { %p697_p7 = scmp.lt.s32.totalorder %s166_s15, %s695_s5  ;;  %p698_p10 = scmp.lt.s32.totalorder %s696_s6, %s689_s0 }
  0x2e   : > { %p692_p5 = pnand %p690_p4, %p650_p1 }
  0x2f   : > { %p699_p13 = por %p698_p10, %p697_p7 }
  0x30   : > { %p693_p6 = pneg %p692_p5 }
  0x32   : > { %p700_p2 = pnand %p699_p13, %p693_p6 }
  0x34   : > { %703 = shalt.err (!%p700_p2)
}
  0x35   : > { %579 = dma.hbm_to_vmem [thread:$0]  (!%p882_p0), %s164_s7, 1152, %s166_s15, %s155_s16, %s791_s18, %s792_s19, %s793_s20  }
  0x36   : > { %177 = sbr.rel (%p904_p3) target bundleno = 142 (0x8e), region = 28  ;;  %s924_s25 = sand.u32 (!%p904_p3), 1, %s772_s10  }
  0x37   : > { %s565_s27 = smul.u32 (!%p904_p3), 112, %s924_s25  ;;  %s180_s26 = scalar_lea.sflag (!%p904_p3), [#allocation3], %s924_s25 }
  0x39   : > { %s928_s0 = scalar_lea.vmem (!%p904_p3), [#allocation2], %s565_s27 }
  0x3b   : > { %755 = dma.done.wait (%p858_p8), %s180_s26, 1792  }
  0x3c   : > { %757 = vsyncadd (%p858_p8), %s180_s26, 4294965504  ;;  %s566_s28 = smul.u32 72, %s924_s25  ;;  %s189_s18 = scalar_lea.sflag [#allocation6], %s924_s25 }
  0x3e   : > { %s936_s19 = scalar_lea.vmem [#allocation5], %s566_s28 }
  0x3f   : > { %759 = dma.done.wait (%p858_p8), %s189_s18, 1152  }
  0x40   : > { %761 = vsyncadd (%p858_p8), %s189_s18, 4294966144  ;;  %v943_v0 = vld [vmem:[%s928_s0 + $0x28] sm:$0xff]  ;;  %v946_v1 = vld [vmem:[%s928_s0 + $0x30] sm:$0xff]  ;;  %s537_s21 = sshll.u32 %s924_s25, 3  ;;  %s560_s20 = sshll.u32 %s780_s12, 7 }
  0x41   : > { %v949_v2 = vld [vmem:[%s928_s0 + $0x38] sm:$0xff]  ;;  %v952_v3 = vld [vmem:[%s928_s0 + $0x40] sm:$0xff]  ;;  %v955_v4 = vld [vmem:[%s928_s0 + $0x50] sm:$0xff]  ;;  %s217_s29 = scalar_lea.vmem [#allocation7], %s537_s21  ;;  %s425_s8 = scalar_lea.hbm %s1138_s2, %s560_s20 }
  0x42   : > { %v958_v5 = vld [vmem:[%s928_s0 + $0x60] sm:$0xff]  ;;  %v265_v6 = vmul.f32 0.5, %v949_v2  ;;  %v267_v7 = vmul.f32 0.5, %v952_v3  ;;  %v963_v8 = vld [vmem:[%s928_s0 + $0x68] sm:$0xff]  ;;  %v973_v12 = vld [vmem:[%s936_s19 + $0x38] sm:$0xff]  ;;  %s427_s30 = sshll.u32 %s217_s29, 4  ;;  %s428_s30 = int_to_ptr.vmem [resolvable:$true] %s427_s30 }
  0x43   : > { %v966_v9 = vld [vmem:[%s936_s19 + $0x28] sm:$0xff]  ;;  %v287_v10 = vmul.f32 0.5, %v958_v5  ;;  %v970_v11 = vld [vmem:[%s936_s19 + $0x30] sm:$0xff]  ;;  %v976_v13 = vld [vmem:[%s936_s19 + $0x40] sm:$0xff]  ;;  %v255_v19 = vmul.f32 0.5, %v973_v12  ;;  %v289_v22 = vmul.f32 0.5, %v963_v8  ;;  %638 = vrsqrt.f32 %v973_v12 }
  0x44   : > { %v266_v14 = vsub.f32 %v943_v0, %v265_v6  ;;  %v268_v15 = vsub.f32 %v946_v1, %v267_v7  ;;  %v269_v16 = vadd.f32 %v943_v0, %v265_v6  ;;  %v270_v17 = vadd.f32 %v946_v1, %v267_v7  ;;  %v983_v18 = vld [vmem:[%s928_s0 + $0x58] sm:$0xff]  ;;  %s414_s15 = scalar_lea.sflag [#allocation4], %s924_s25  ;;  %s704_s16 = scalar_lea.vmem %s428_s30, 128 }
  0x45   : > { %v257_v20 = vmul.f32 0.5, %v976_v13  ;;  %v288_v21 = vsub.f32 %v955_v4, %v287_v10  ;;  %v291_v25 = vadd.f32 %v955_v4, %v287_v10  ;;  %v256_v26 = vsub.f32 %v966_v9, %v255_v19  ;;  %p705_p8 = scmp.ne.s32.totalorder %s428_s30, %s704_s16  ;;  %s795_s3 = smov [#allocation7]  }
  0x46   : > { %v280_v23 = vsub.f32 %v269_v16, %v266_v14  ;;  %v281_v24 = vsub.f32 %v270_v17, %v268_v15  ;;  %v259_v28 = vadd.f32 %v966_v9, %v255_v19  ;;  %v290_v31 = vsub.f32 %v983_v18, %v289_v22  ;;  %s708_s5 = sshll.u32 %s795_s3, 4  ;;  %s709_s5 = int_to_ptr.vmem [resolvable:$false] %s708_s5 }
  0x47   : > { %v258_v27 = vsub.f32 %v970_v11, %v257_v20  ;;  %v260_v29 = vadd.f32 %v970_v11, %v257_v20  ;;  %v292_v32 = vadd.f32 %v983_v18, %v289_v22  ;;  %v302_v33 = vsub.f32 %v291_v25, %v288_v21  ;;  %p706_p0 = pnand %p705_p8, %p862_p9  ;;  %s710_s6 = scalar_lea.vmem %s709_s5, 256 }
  0x48   : > { %v282_v30 = vmul.f32 %v281_v24, %v280_v23  ;;  %v261_v34 = vsub.f32 %v259_v28, %v256_v26  ;;  %v271_v36 = vmax.f32 %v266_v14, %v256_v26  ;;  %v273_v38 = vmin.f32 %v269_v16, %v259_v28  ;;  %v1029_v23 = vld [vmem:[%s936_s19 + $0x20] sm:$0xff]  ;;  %v553_v24 = vld [vmem:[%s928_s0 + $0x8] sm:$0xff]  ;;  %p711_p3 = scmp.lt.s32.totalorder %s428_s30, %s709_s5  ;;  %p712_p4 = scmp.lt.s32.totalorder %s710_s6, %s704_s16 }
  0x49   : > { %v262_v35 = vsub.f32 %v260_v29, %v258_v27  ;;  %v272_v37 = vmax.f32 %v268_v15, %v258_v27  ;;  %v274_v39 = vmin.f32 %v270_v17, %v260_v29  ;;  %v293_v41 = vmax.f32 %v288_v21, %v256_v26  ;;  %p707_p1 = pneg %p706_p0 }
  0x4a   : > { %v283_v40 = vand.u32 2147483647, %v282_v30  ;;  %v294_v43 = vmax.f32 %v290_v31, %v258_v27  ;;  %v295_v44 = vmin.f32 %v291_v25, %v259_v28  ;;  %v296_v45 = vmin.f32 %v292_v32, %v260_v29  ;;  %v554_v25 = vld [vmem:[%s936_s19 + $0x8] sm:$0xff]  ;;  %p713_p5 = por %p712_p4, %p711_p3 }
  0x4b   : > { %v263_v42 = vmul.f32 %v262_v35, %v261_v34  ;;  %v275_v46 = vsub.f32 %v273_v38, %v271_v36  ;;  %v277_v47 = vsub.f32 %v274_v39, %v272_v37  ;;  %v303_v48 = vsub.f32 %v292_v32, %v290_v31  ;;  %v538_v28 = vld [vmem:[%s928_s0 + $0x20] sm:$0xff]  ;;  %v543_v29 = vld [vmem:[%s928_s0 + $0x48] sm:$0xff]  ;;  %v555_v31 = vld [vmem:[%s928_s0 + $0x10] sm:$0xff] }
  0x4c   : > { %v297_v50 = vsub.f32 %v295_v44, %v293_v41  ;;  %v299_v51 = vsub.f32 %v296_v45, %v294_v43  ;;  %640 = vrsqrt.f32 %v976_v13  ;;  %v321_v27 = vsub.f32 1.0, %v1029_v23  ;;  %v558_v34 = vld [vmem:[%s936_s19 + $0x18] sm:$0xff]  ;;  %p714_p6 = pnand %p713_p5, %p707_p1 }
  0x4d   : > { %v264_v49 = vand.u32 2147483647, %v263_v42  ;;  %v276_v52 = vmax.f32 %v275_v46, 0.0  ;;  %v278_v53 = vmax.f32 %v277_v47, 0.0  ;;  %v304_v54 = vmul.f32 %v303_v48, %v302_v33 }
  0x4e   : > { %v298_v56 = vmax.f32 %v297_v50, 0.0  ;;  %v300_v57 = vmax.f32 %v299_v51, 0.0  ;;  %vm336_vm1 = vcmp.eq.f32.partialorder %v973_v12, inf  ;;  %v374_v33 = vsub.f32 %v553_v24, %v554_v25 }
  0x4f   : > { %v284_v55 = vadd.f32 %v283_v40, %v264_v49  ;;  %v996_v58 = vmul.f32 %v278_v53, %v276_v52  ;;  %v305_v59 = vand.u32 2147483647, %v304_v54  ;;  %vm338_vm2 = vcmp.eq.f32.partialorder %v973_v12, 0.0 }
  0x50   : > { %v998_v60 = vmul.f32 %v300_v57, %v298_v56  ;;  %v639_v22 = vpop.eup %638  ;;  %v339_v35 = vand.u32 2147483648, %v973_v12  ;;  %vm353_vm3 = vcmp.eq.f32.partialorder %v976_v13, inf  ;;  %vm355_vm4 = vcmp.eq.f32.partialorder %v976_v13, 0.0 }
  0x51   : > { %v285_v61 = vsub.f32 %v284_v55, %v996_v58  ;;  %v306_v62 = vadd.f32 %v305_v59, %v264_v49  ;;  %v335_v32 = vmul.f32 %v639_v22, %v973_v12  ;;  %v362_v37 = vmul.f32 %v538_v28, %v321_v27 }
  0x52   : > { %v375_v46 = vmul.f32 %v1029_v23, %v374_v33 }
  0x53   : > { %v286_v63 = vadd.f32 1e-06, %v285_v61  ;;  %v307_v6 = vsub.f32 %v306_v62, %v998_v60  ;;  %v337_v45 = vsel %vm336_vm1, %v973_v12, %v335_v32 }
  0x54   : > { %v340_v55 = vsel %vm338_vm2, %v339_v35, %v337_v45 }
  0x55   : > { %v308_v7 = vadd.f32 1e-06, %v307_v6  ;;  %v310_v10 = vmul.f32 %v998_v60, %v286_v63 }
  0x57   : > { %v309_v14 = vmul.f32 %v308_v7, %v996_v58 }
  0x59   : > { %vm1006_vm0 = vcmp.ge.f32.partialorder %v309_v14, %v310_v10  ;;  %v641_v26 = vpop.eup %640  ;;  %v376_v14 = vmul.f32 %v375_v46, %v375_v46 }
  0x5a   : > { %v314_v16 = vsel %vm1006_vm0, %v949_v2, %v958_v5  ;;  %v315_v17 = vsel %vm1006_vm0, %v952_v3, %v963_v8  ;;  %v318_v19 = vsel %vm1006_vm0, %v286_v63, %v308_v7  ;;  %v364_v2 = vld [vmem:[%s928_s0] sm:$0xff]  ;;  %v312_v3 = vsel %vm1006_vm0, %v943_v0, %v955_v4 }
  0x5b   : > { %642 = vrcp.f32 %v318_v19  ;;  %v1020_v20 = vmax.f32 %v314_v16, 1e-06  ;;  %v1022_v21 = vmax.f32 %v315_v17, 1e-06  ;;  %v365_v5 = vld [vmem:[%s936_s19] sm:$0xff]  ;;  %v313_v8 = vsel %vm1006_vm0, %v946_v1, %v983_v18  ;;  %v556_v1 = vld [vmem:[%s936_s19 + $0x10] sm:$0xff] }
  0x5c   : > { %v366_v30 = vsub.f32 %v364_v2, %v365_v5  ;;  %v322_v0 = vsub.f32 %v312_v3, %v966_v9  ;;  %v324_v4 = vsub.f32 %v313_v8, %v970_v11  ;;  %v557_v18 = vld [vmem:[%s928_s0 + $0x18] sm:$0xff]  ;;  %v352_v36 = vmul.f32 %v641_v26, %v976_v13 }
  0x5d   : > { %644 = vrsqrt.f32 %v1020_v20  ;;  %v356_v9 = vand.u32 2147483648, %v976_v13  ;;  %v363_v11 = vmul.f32 %v543_v29, %v321_v27  ;;  %v317_v39 = vsel %vm1006_vm0, %v996_v58, %v998_v60 }
  0x5e   : > { %646 = vrsqrt.f32 %v1022_v21  ;;  %v367_v40 = vmul.f32 %v1029_v23, %v366_v30  ;;  %v382_v41 = vsub.f32 %v555_v31, %v556_v1  ;;  %v390_v42 = vsub.f32 %v557_v18, %v558_v34 }
  0x5f   : > { %v323_v43 = vmul.f32 %v1029_v23, %v322_v0  ;;  %v325_v44 = vmul.f32 %v1029_v23, %v324_v4  ;;  %vm329_vm5 = vcmp.eq.f32.partialorder %v1020_v20, inf  ;;  %vm331_vm6 = vcmp.eq.f32.partialorder %v1020_v20, 0.0 }
  0x60   : > { %v332_v48 = vand.u32 2147483648, %v1020_v20  ;;  %v354_v49 = vsel %vm353_vm3, %v976_v13, %v352_v36  ;;  %vm346_vm7 = vcmp.eq.f32.partialorder %v1022_v21, inf  ;;  %v349_v53 = vand.u32 2147483648, %v1022_v21 }
  0x61   : > { %v316_v54 = vsel %vm1006_vm0, %v538_v28, %v543_v29  ;;  %vm348_vm8 = vcmp.eq.f32.partialorder %v1022_v21, 0.0  ;;  %v357_v58 = vsel %vm355_vm4, %v356_v9, %v354_v49  ;;  %v394_v59 = vmul.f32 %v323_v43, %v323_v43 }
  0x62   : > { %v395_v60 = vmul.f32 %v325_v44, %v325_v44  ;;  %v368_v63 = vmul.f32 %v367_v40, %v367_v40  ;;  %v383_v12 = vmul.f32 %v1029_v23, %v382_v41  ;;  %v404_v13 = vmul.f32 %v362_v37, %v362_v37 }
  0x63   : > { %v405_v19 = vmul.f32 %v363_v11, %v363_v11 }
  0x64   : > { %v396_v17 = vadd.f32 %v395_v60, %v394_v59  ;;  %v377_v5 = vadd.f32 %v376_v14, %v368_v63  ;;  %v384_v22 = vmul.f32 %v383_v12, %v383_v12 }
  0x65   : > { %v406_v25 = vadd.f32 %v405_v19, %v404_v13 }
  0x66   : > { %v385_v26 = vadd.f32 %v384_v22, %v377_v5 }
  0x67   : > { %v407_v31 = vmul.f32 0.5, %v406_v25 }
  0x68   : > { %v643_v38 = vpop.eup %642 }
  0x69   : > { %v320_v51 = vmul.f32 %v643_v38, %v317_v39 }
  0x6a   : > { %v645_v47 = vpop.eup %644 }
  0x6b   : > { %v647_v50 = vpop.eup %646  ;;  %v328_v52 = vmul.f32 %v645_v47, %v1020_v20  ;;  %v360_v10 = vsub.f32 %v316_v54, %v320_v51 }
  0x6c   : > { %v345_v56 = vmul.f32 %v647_v50, %v1022_v21 }
  0x6d   : > { %v330_v57 = vsel %vm329_vm5, %v1020_v20, %v328_v52  ;;  %v391_v20 = vmul.f32 %v1029_v23, %v390_v42 }
  0x6e   : > { %v333_v61 = vsel %vm331_vm6, %v332_v48, %v330_v57  ;;  %v347_v62 = vsel %vm346_vm7, %v1022_v21, %v345_v56  ;;  %v361_v21 = vmul.f32 %v1029_v23, %v360_v10 }
  0x6f   : > { %v341_v6 = vsub.f32 %v333_v61, %v340_v55  ;;  %v350_v7 = vsel %vm348_vm8, %v349_v53, %v347_v62  ;;  %v392_v27 = vmul.f32 %v391_v20, %v391_v20 }
  0x70   : > { %v358_v15 = vsub.f32 %v350_v7, %v357_v58  ;;  %v402_v29 = vmul.f32 %v361_v21, %v361_v21 }
  0x71   : > { %v342_v16 = vmul.f32 %v1029_v23, %v341_v6  ;;  %v393_v0 = vadd.f32 %v392_v27, %v385_v26 }
  0x72   : > { %v359_v2 = vmul.f32 %v1029_v23, %v358_v15 }
  0x73   : > { %v397_v3 = vmul.f32 %v342_v16, %v342_v16 }
  0x74   : > { %v399_v8 = vmul.f32 %v359_v2, %v359_v2 }
  0x75   : > { %v398_v24 = vadd.f32 %v397_v3, %v396_v17 }
  0x77   : > { %v400_v28 = vadd.f32 %v399_v8, %v398_v24 }
  0x79   : > { %v401_v30 = vmul.f32 5.0, %v400_v28 }
  0x7b   : > { %v403_v4 = vadd.f32 %v402_v29, %v401_v30 }
  0x7d   : > { %v408_v32 = vadd.f32 %v407_v31, %v403_v4 }
  0x7f   : > { %v409_v23 = vadd.f32 %v408_v32, %v393_v0 }
  0x81   : > { %412 = vst [vmem:[%s217_s29] sm:$0xff] %v409_v23 }
  0x82   : > { %717 = shalt.err (!%p714_p6)
}
  0x83   : > { %s718_s12 = scalar_lea.hbm %s425_s8, 128  ;;  %s722_s26 = scalar_lea.hbm %s1138_s2, 256 }
  0x84   : > { %p719_p7 = scmp.ne.s32.totalorder %s425_s8, %s718_s12  ;;  %p723_p2 = scmp.lt.s32.totalorder %s425_s8, %s1138_s2 }
  0x85   : > { %p724_p8 = scmp.lt.s32.totalorder %s722_s26, %s718_s12 }
  0x86   : > { %p720_p10 = pnand %p719_p7, %p862_p9 }
  0x87   : > { %p725_p0 = por %p724_p8, %p723_p2 }
  0x88   : > { %p721_p13 = pneg %p720_p10 }
  0x8a   : > { %p726_p12 = pnand %p725_p0, %p721_p13 }
  0x8c   : > { %729 = shalt.err (!%p726_p12)
}
  0x8d   : > { %571 = dma.vmem_to_hbm [thread:$0]  (%p862_p9), %s428_s30, 128, %s425_s8, %s414_s15  }
  0x8e PF: > { %s439_s18 = sand.u32 1, %s768_s9   ;;  %p1149_p1 = scmp.ge.s32.totalorder %s788_s14, 2 }
  0x8f   : > { %s440_s19 = scalar_lea.sflag [#allocation4], %s439_s18 }
  0x90   : > { %p581_p3 = pnand %p1149_p1, %p869_p11 }
  0x92   : > { %p582_p4 = pneg %p581_p3 }
  0x94   : > { %763 = dma.done.wait (%p582_p4), %s440_s19, 128  }
  0x95   : > { %765 = vsyncadd (%p582_p4), %s440_s19, 4294967168  ;;  %s21_s14 = sadd.s32 1, %s788_s14   ;;  %s1150_s9 = smov %s772_s10 }
  0x96   : > { %p18_p5 = scmp.ge.s32.totalorder %s21_s14, 4   ;;  %s1151_s10 = smov %s776_s11 }
  0x97   : > { %s1152_s11 = smov %s867_s23  ;;  %s1153_s12 = smov %s784_s13 }
  0x98   : > { %s1154_s13 = smov %s1156_s17  ;;  %20 = sbr.rel (!%p18_p5) target bundleno = 10 (0xa), region = 111 }
  0x9d   :  { %445 = vsyncpa [#allocation3], 1 }
  0x9e   :  { %447 = vsyncpa [#allocation3 + $0x1], 1 }
  0x9f   :  { %448 = vsyncpa [#allocation6], 1 }
  0xa0   :  { %450 = vsyncpa [#allocation6 + $0x1], 1 }
  0xa1   :  { %451 = vsyncpa [#allocation4], 1 }
  0xa2   :  { %453 = vsyncpa [#allocation4 + $0x1], 1 }

</bundles_post_ra>
